<compile_context>
chip_gen: v6e
topology: v6e:2x2x1
jax: 0.10.0
libtpu: 0.0.40
codegen_flags: <defaults>
</compile_context>

<pallas_src>
import math

import jax
import jax.numpy as jnp
from jax.experimental import pallas as pl
from jax.experimental.pallas import tpu as pltpu

NEG_BIG = -1e30  # bias for padded softmax lanes -> exp() underflows to exactly 0


def _round_up(n, m):
    return ((n + m - 1) // m) * m


# ----------------------------------------------------------------------------
# Pallas kernel (specialized to the static, lane-dense layer/skip structure)
# ----------------------------------------------------------------------------
def make_policy_kernel(layer_meta, out_cols):
    """layer_meta: tuple of (skip_type, n_pad) per hidden layer.

    n_pad is the lane-dense (multiple-of-128) padded output width of the layer.
    Refs: x (B_pad, k0_pad) f32, w_slab (L+1, K_pad, N_pad) bf16,
          bias_pack (8, N_pad) f32, out (B_pad, out_cols) f32.
    Weight row i already has its BatchNorm + bias folded in; for 'linear'
    skips the main and skip weights are each padded to n_pad lanes and then
    concatenated along N, so the split below is a vreg-boundary split.
    """
    L = len(layer_meta)

    def kernel(x_ref, w_ref, b_ref, out_ref):
        x = x_ref[...].astype(jnp.float32)      # lane-dense (B_pad, k0_pad)
        k = x.shape[-1]                          # static per-layer K
        for i, (skip, n_pad) in enumerate(layer_meta):
            w_cols = 2 * n_pad if skip == "linear" else n_pad
            # bf16 MXU inputs, f32 accumulation; static slab slices are free.
            z = jnp.dot(x.astype(jnp.bfloat16), w_ref[i, :k, :w_cols],
                        preferred_element_type=jnp.float32)
            z = z + b_ref[i:i + 1, :w_cols]
            if skip == "linear":
                # fused [main | skip] matmul, split at a 128-lane vreg boundary
                h = jnp.maximum(z[:, :n_pad], 0.0) + z[:, n_pad:]
            else:
                h = jnp.maximum(z, 0.0)
                if skip == "identity":
                    h = h + x
            x = h
            k = n_pad

        # output projection (lane-dense padded N) + softmax(dim=-1)
        logits = (jnp.dot(x.astype(jnp.bfloat16), w_ref[L, :k, :out_cols],
                          preferred_element_type=jnp.float32)
                  + b_ref[L:L + 1, :out_cols])
        m = jnp.max(logits, axis=-1, keepdims=True)
        e = jnp.exp(logits - m)
        denom = jnp.sum(e, axis=-1, keepdims=True)
        r = pl.reciprocal(denom, approx=True)    # EUP slot (free)
        r = r * (2.0 - denom * r)                # one Newton step -> ~f32 accuracy
        out_ref[...] = (e * r).astype(out_ref.dtype)

    return kernel


def policy_forward_pallas(x, w_slab, bias_pack, layer_meta, output_dim, out_cols):
    """Wrapper reproducing PolicyNetwork.forward (eval mode)."""
    squeeze = False
    if x.ndim == 1:
        x = x[None, :]
        squeeze = True
    batch, d = x.shape
    # Pad batch to a multiple of 8 sublanes and features to 128 lanes so every
    # vreg is fully dense and the output store is a single unmasked vst.
    b_pad = _round_up(max(batch, 1), 8)
    k0_pad = _round_up(d, 128)
    x_pad = jnp.zeros((b_pad, k0_pad), jnp.float32).at[:batch, :d].set(
        x.astype(jnp.float32))

    kernel = make_policy_kernel(tuple(layer_meta), out_cols)
    out = pl.pallas_call(
        kernel,
        out_shape=jax.ShapeDtypeStruct((b_pad, out_cols), jnp.float32),
        # Tiny problem: everything is VMEM-resident, single gridless call.
        in_specs=[pl.BlockSpec(memory_space=pltpu.MemorySpace.VMEM)] * 3,
        out_specs=pl.BlockSpec(memory_space=pltpu.MemorySpace.VMEM),
    )(x_pad, w_slab, bias_pack)

    out = out[:batch, :output_dim]
    if squeeze:
        out = out[0]
    return out


# ----------------------------------------------------------------------------
# Deterministic "module-like" parameter construction (matches nn.Module shapes)
# ----------------------------------------------------------------------------
def init_params(key, input_dim, hidden_dims, output_dim, eps=1e-5):
    keys = iter(jax.random.split(key, 8 * (len(hidden_dims) + 2)))

    def linear(fan_in, fan_out):
        bound = 1.0 / math.sqrt(fan_in)
        w = jax.random.uniform(next(keys), (fan_in, fan_out), jnp.float32, -bound, bound)
        b = jax.random.uniform(next(keys), (1, fan_out), jnp.float32, -bound, bound)
        return w, b

    def folded_bn(dim):
        gamma = 1.0 + 0.1 * jax.random.normal(next(keys), (1, dim), jnp.float32)
        beta = 0.1 * jax.random.normal(next(keys), (1, dim), jnp.float32)
        running_mean = 0.1 * jax.random.normal(next(keys), (1, dim), jnp.float32)
        running_var = 0.5 + 0.5 * jnp.abs(jax.random.normal(next(keys), (1, dim), jnp.float32))
        scale = gamma / jnp.sqrt(running_var + eps)
        shift = beta - running_mean * scale
        return scale, shift

    params = {"input_bn": folded_bn(input_dim), "layers": [], "skip_types": []}
    prev = input_dim
    for i, hdim in enumerate(hidden_dims):
        w, b = linear(prev, hdim)
        s, t = folded_bn(hdim)
        layer = {"w": w, "b": b, "s": s, "t": t, "skip": None}
        if i > 0 and prev == hdim:
            params["skip_types"].append("identity")
        elif i > 0:
            params["skip_types"].append("linear")
            layer["skip"] = linear(prev, hdim)
        else:
            params["skip_types"].append("none")
        params["layers"].append(layer)
        prev = hdim
    params["out"] = linear(prev, output_dim)
    return params


# ----------------------------------------------------------------------------
# Host-side folding / padding / packing into the kernel's fused argument layout
# ----------------------------------------------------------------------------
def pack_params(params, output_dim):
    skip_types = params["skip_types"]
    s_in, t_in = params["input_bn"]
    wo, bo = params["out"]

    pieces = []      # (padded weight (K_i, W_i), padded bias (1, W_i)) per matmul
    layer_meta = []
    cur_k = _round_up(params["layers"][0]["w"].shape[0], 128)  # padded input width

    for i, layer in enumerate(params["layers"]):
        w0, b0, s, t = layer["w"], layer["b"], layer["s"], layer["t"]
        hdim = w0.shape[1]
        n_pad = _round_up(hdim, 128)
        if i == 0:
            # fold the input BN into layer 0 (legal: layer 0 has no skip branch)
            b = t_in @ w0 + b0
            w = s_in.reshape(-1, 1) * w0
        else:
            w, b = w0, b0
        # fold the post-linear BN (column scale / shift) into W and b
        w_eff = w * s
        b_eff = b * s + t
        # lane-dense padding: zero-pad K rows and N columns to 128 multiples
        w_main = jnp.zeros((cur_k, n_pad), jnp.float32).at[:w_eff.shape[0], :hdim].set(w_eff)
        b_main = jnp.zeros((1, n_pad), jnp.float32).at[:, :hdim].set(b_eff)
        if skip_types[i] == "linear":
            ws, bs = layer["skip"]
            w_skip = jnp.zeros((cur_k, n_pad), jnp.float32).at[:ws.shape[0], :hdim].set(ws)
            b_skip = jnp.zeros((1, n_pad), jnp.float32).at[:, :hdim].set(bs)
            w_full = jnp.concatenate([w_main, w_skip], axis=1)   # [main(128k) | skip(128k)]
            b_full = jnp.concatenate([b_main, b_skip], axis=1)
        else:
            w_full, b_full = w_main, b_main
        pieces.append((w_full, b_full))
        layer_meta.append((skip_types[i], n_pad))
        cur_k = n_pad

    # output projection, zero-padded to a lane-dense (multiple of 128) N;
    # padded lanes get a hugely negative bias so softmax ignores them exactly.
    out_cols = _round_up(output_dim, 128)
    w_out = jnp.zeros((cur_k, out_cols), jnp.float32).at[:wo.shape[0], :output_dim].set(wo)
    b_out = jnp.full((1, out_cols), NEG_BIG, jnp.float32).at[:, :output_dim].set(bo)
    pieces.append((w_out, b_out))

    # ONE bf16 weight slab (L+1, K_pad, N_pad) and ONE f32 bias pack (8, N_pad).
    k_slab = max(w.shape[0] for w, _ in pieces)
    n_slab = max(w.shape[1] for w, _ in pieces)
    w_slab = jnp.stack(
        [jnp.pad(w, ((0, k_slab - w.shape[0]), (0, n_slab - w.shape[1])))
         for w, _ in pieces], axis=0).astype(jnp.bfloat16)
    bias_pack = jnp.zeros((_round_up(len(pieces), 8), n_slab), jnp.float32)
    for i, (_, b) in enumerate(pieces):
        bias_pack = bias_pack.at[i, :b.shape[1]].set(b[0])

    return w_slab, bias_pack, tuple(layer_meta), out_cols


# ----------------------------------------------------------------------------
# Pure-JAX f32 reference (unfused math, straight off the module) for verification
# ----------------------------------------------------------------------------
def policy_forward_reference(x, params):
    if x.ndim == 1:
        x = x[None, :]
    s_in, t_in = params["input_bn"]
    x = x.astype(jnp.float32) * s_in + t_in
    for layer, skip in zip(params["layers"], params["skip_types"]):
        h = jnp.maximum((x @ layer["w"] + layer["b"]) * layer["s"] + layer["t"], 0.0)
        if skip == "identity":
            h = h + x
        elif skip == "linear":
            ws, bs = layer["skip"]
            h = h + x @ ws + bs
        x = h
    wo, bo = params["out"]
    out = jax.nn.softmax(x @ wo + bo, axis=-1)
    if out.shape[0] == 1:
        out = out[0]
    return out


if __name__ == "__main__":
    # batch=8, input_dim=16, hidden_dims=[32, 32, 64], output_dim=8
    # hidden_dims exercises all three skip types: None, Identity (32==32),
    # and Linear (32 -> 64).
    batch, input_dim, hidden_dims, output_dim = 8, 16, [32, 32, 64], 8

    key = jax.random.PRNGKey(0)
    k_x, k_p = jax.random.split(key)
    x = jax.random.normal(k_x, (batch, input_dim), jnp.float32)

    params = init_params(k_p, input_dim, hidden_dims, output_dim)
    w_slab, bias_pack, layer_meta, out_cols = pack_params(params, output_dim)

    probs = policy_forward_pallas(x, w_slab, bias_pack, layer_meta, output_dim, out_cols)
    probs = jax.block_until_ready(probs)

    ref = policy_forward_reference(x, params)
    assert probs.shape == (batch, output_dim)
    # Softmax epilogue is f32 with a Newton-refined reciprocal -> sums to ~1.
    assert jnp.allclose(jnp.sum(probs, axis=-1), 1.0, atol=1e-4)
    # bf16 MXU weight path vs. the full-f32 reference: loose tolerance by design.
    assert jnp.allclose(probs, ref, rtol=5e-2, atol=2e-3)

    print("KERNEL_OK")
</pallas_src>

<mosaic_0001>
module attributes {stable_mosaic.version = 11 : i64} {
  func.func @kernel(%arg0: memref<8x128xf32, #tpu.memory_space<vmem>>, %arg1: memref<4x128x256xbf16, #tpu.memory_space<vmem>>, %arg2: memref<8x256xf32, #tpu.memory_space<vmem>>, %arg3: memref<8x128xf32, #tpu.memory_space<vmem>>) attributes {dimension_semantics = [], scalar_prefetch = 0 : i64, scratch_operands = 0 : i64, tpu.core_type = #tpu.core_type<tc>} {
    %c0 = arith.constant 0 : index
    %c0_0 = arith.constant 0 : index
    %0 = vector.load %arg0[%c0, %c0_0] : memref<8x128xf32, #tpu.memory_space<vmem>>, vector<8x128xf32>
    %1 = arith.truncf %0 : vector<8x128xf32> to vector<8x128xbf16>
    %c0_1 = arith.constant 0 : index
    %c0_2 = arith.constant 0 : index
    %c0_3 = arith.constant 0 : index
    %2 = vector.load %arg1[%c0_1, %c0_2, %c0_3] : memref<4x128x256xbf16, #tpu.memory_space<vmem>>, vector<1x128x128xbf16>
    %3 = vector.shape_cast %2 : vector<1x128x128xbf16> to vector<128x128xbf16>
    %cst = arith.constant dense<0.000000e+00> : vector<8x128xf32>
    %4 = tpu.matmul %1, %3, %cst {dimension_numbers = #tpu.dot_dimension_numbers<[1], [0], [0], [1], [0, 0, 1, 1], [], []>} : vector<8x128xbf16>, vector<128x128xbf16>, vector<8x128xf32> -> vector<8x128xf32>
    %c0_4 = arith.constant 0 : index
    %c0_5 = arith.constant 0 : index
    %5 = vector.load %arg2[%c0_4, %c0_5] : memref<8x256xf32, #tpu.memory_space<vmem>>, vector<1x128xf32>
    %6 = vector.broadcast %5 : vector<1x128xf32> to vector<8x128xf32>
    %7 = arith.addf %4, %6 : vector<8x128xf32>
    %cst_6 = arith.constant 0.000000e+00 : f32
    %8 = vector.broadcast %cst_6 : f32 to vector<8x128xf32>
    %9 = arith.maximumf %7, %8 : vector<8x128xf32>
    %10 = arith.truncf %9 : vector<8x128xf32> to vector<8x128xbf16>
    %c1 = arith.constant 1 : index
    %c0_7 = arith.constant 0 : index
    %c0_8 = arith.constant 0 : index
    %11 = vector.load %arg1[%c1, %c0_7, %c0_8] : memref<4x128x256xbf16, #tpu.memory_space<vmem>>, vector<1x128x128xbf16>
    %12 = vector.shape_cast %11 : vector<1x128x128xbf16> to vector<128x128xbf16>
    %cst_9 = arith.constant dense<0.000000e+00> : vector<8x128xf32>
    %13 = tpu.matmul %10, %12, %cst_9 {dimension_numbers = #tpu.dot_dimension_numbers<[1], [0], [0], [1], [0, 0, 1, 1], [], []>} : vector<8x128xbf16>, vector<128x128xbf16>, vector<8x128xf32> -> vector<8x128xf32>
    %c1_10 = arith.constant 1 : index
    %c0_11 = arith.constant 0 : index
    %14 = vector.load %arg2[%c1_10, %c0_11] : memref<8x256xf32, #tpu.memory_space<vmem>>, vector<1x128xf32>
    %15 = vector.broadcast %14 : vector<1x128xf32> to vector<8x128xf32>
    %16 = arith.addf %13, %15 : vector<8x128xf32>
    %cst_12 = arith.constant 0.000000e+00 : f32
    %17 = vector.broadcast %cst_12 : f32 to vector<8x128xf32>
    %18 = arith.maximumf %16, %17 : vector<8x128xf32>
    %19 = arith.addf %18, %9 : vector<8x128xf32>
    %20 = arith.truncf %19 : vector<8x128xf32> to vector<8x128xbf16>
    %c2 = arith.constant 2 : index
    %c0_13 = arith.constant 0 : index
    %c0_14 = arith.constant 0 : index
    %21 = vector.load %arg1[%c2, %c0_13, %c0_14] : memref<4x128x256xbf16, #tpu.memory_space<vmem>>, vector<1x128x256xbf16>
    %22 = vector.shape_cast %21 : vector<1x128x256xbf16> to vector<128x256xbf16>
    %cst_15 = arith.constant dense<0.000000e+00> : vector<8x256xf32>
    %23 = tpu.matmul %20, %22, %cst_15 {dimension_numbers = #tpu.dot_dimension_numbers<[1], [0], [0], [1], [0, 0, 1, 1], [], []>} : vector<8x128xbf16>, vector<128x256xbf16>, vector<8x256xf32> -> vector<8x256xf32>
    %c2_16 = arith.constant 2 : index
    %c0_17 = arith.constant 0 : index
    %24 = vector.load %arg2[%c2_16, %c0_17] : memref<8x256xf32, #tpu.memory_space<vmem>>, vector<1x256xf32>
    %25 = vector.broadcast %24 : vector<1x256xf32> to vector<8x256xf32>
    %26 = arith.addf %23, %25 : vector<8x256xf32>
    %27 = vector.extract_strided_slice %26 {offsets = [0, 0], sizes = [8, 128], strides = [1, 1]} : vector<8x256xf32> to vector<8x128xf32>
    %cst_18 = arith.constant 0.000000e+00 : f32
    %28 = vector.broadcast %cst_18 : f32 to vector<8x128xf32>
    %29 = arith.maximumf %27, %28 : vector<8x128xf32>
    %30 = vector.extract_strided_slice %26 {offsets = [0, 128], sizes = [8, 128], strides = [1, 1]} : vector<8x256xf32> to vector<8x128xf32>
    %31 = arith.addf %29, %30 : vector<8x128xf32>
    %32 = arith.truncf %31 : vector<8x128xf32> to vector<8x128xbf16>
    %c3 = arith.constant 3 : index
    %c0_19 = arith.constant 0 : index
    %c0_20 = arith.constant 0 : index
    %33 = vector.load %arg1[%c3, %c0_19, %c0_20] : memref<4x128x256xbf16, #tpu.memory_space<vmem>>, vector<1x128x128xbf16>
    %34 = vector.shape_cast %33 : vector<1x128x128xbf16> to vector<128x128xbf16>
    %cst_21 = arith.constant dense<0.000000e+00> : vector<8x128xf32>
    %35 = tpu.matmul %32, %34, %cst_21 {dimension_numbers = #tpu.dot_dimension_numbers<[1], [0], [0], [1], [0, 0, 1, 1], [], []>} : vector<8x128xbf16>, vector<128x128xbf16>, vector<8x128xf32> -> vector<8x128xf32>
    %c3_22 = arith.constant 3 : index
    %c0_23 = arith.constant 0 : index
    %36 = vector.load %arg2[%c3_22, %c0_23] : memref<8x256xf32, #tpu.memory_space<vmem>>, vector<1x128xf32>
    %37 = vector.broadcast %36 : vector<1x128xf32> to vector<8x128xf32>
    %38 = arith.addf %35, %37 : vector<8x128xf32>
    %cst_24 = arith.constant dense<0xFF800000> : vector<8xf32>
    %39 = vector.multi_reduction <maximumf>, %38, %cst_24 [1] : vector<8x128xf32> to vector<8xf32>
    %40 = vector.shape_cast %39 : vector<8xf32> to vector<8x1xf32>
    %41 = vector.broadcast %40 : vector<8x1xf32> to vector<8x128xf32>
    %42 = arith.subf %38, %41 : vector<8x128xf32>
    %43 = math.exp %42 : vector<8x128xf32>
    %cst_25 = arith.constant dense<0.000000e+00> : vector<8xf32>
    %44 = vector.multi_reduction <add>, %43, %cst_25 [1] : vector<8x128xf32> to vector<8xf32>
    %45 = vector.shape_cast %44 : vector<8xf32> to vector<8x1xf32>
    %46 = tpu.reciprocal %45 {approx = true} : vector<8x1xf32> -> vector<8x1xf32>
    %47 = arith.mulf %45, %46 : vector<8x1xf32>
    %cst_26 = arith.constant 2.000000e+00 : f32
    %48 = vector.broadcast %cst_26 : f32 to vector<8x1xf32>
    %49 = arith.subf %48, %47 : vector<8x1xf32>
    %50 = arith.mulf %46, %49 : vector<8x1xf32>
    %51 = vector.broadcast %50 : vector<8x1xf32> to vector<8x128xf32>
    %52 = arith.mulf %43, %51 : vector<8x128xf32>
    %c0_27 = arith.constant 0 : index
    %c0_28 = arith.constant 0 : index
    %53 = vector.load %arg3[%c0_27, %c0_28] : memref<8x128xf32, #tpu.memory_space<vmem>>, vector<8x128xf32>
    tpu.vector_store %arg3[%c0_27, %c0_28], %52 {strides = array<i32>} : memref<8x128xf32, #tpu.memory_space<vmem>>, vector<8x128xf32>,
    return
  }
}

</mosaic_0001>

<bundles_post_ra>
// kernel: tpu_custom_call.1
= control target key start
LH: loop header
LB: loop body
LE: loop exit
PB: predicated region body
PF: predicated region fallthrough
CT: control target
= control target key end

     0   :  { %8 = vsyncpa [#allocation3], 0  ;;  %s905_s0 = inlined_call_operand.hbm [shape: f32[8,128], index: 0, kind: input, shape index: {}]   ;;  %s906_s1 = inlined_call_operand.hbm [shape: bf16[4,128,256], index: 1, kind: input, shape index: {}]   ;;  %s907_s2 = inlined_call_operand.hbm [shape: f32[8,256], index: 2, kind: input, shape index: {}]   ;;  %s908_s3 = inlined_call_operand.hbm [shape: f32[8,128], index: 3, kind: output, shape index: {}]  }
   0x1   :  { %9 = vsyncpa [#allocation6], 0 }
   0x2   :  { %10 = vsyncpa [#allocation4], 0  ;;  %s834_s12 = smov [#allocation5]  }
   0x3   :  { %s26_s13 = sshll.u32 %s834_s12, 4  ;;  %s27_s13 = int_to_ptr.vmem [resolvable:$true] %s26_s13 }
   0x4   :  { %s756_s14 = scalar_lea.vmem %s27_s13, 8192  ;;  %p761_p1 = scmp.lt.s32.totalorder %s27_s13, %s27_s13 }
   0x5   :  { %p757_p0 = scmp.ne.s32.totalorder %s27_s13, %s756_s14  ;;  %p762_p2 = scmp.lt.s32.totalorder %s756_s14, %s756_s14 }
   0x7   :  { %p763_p3 = por %p762_p2, %p761_p1 }
   0x9   :  { %p764_p4 = pnand %p763_p3, %p757_p0 }
   0xb   :  { %767 = shalt.err (!%p764_p4)
}
   0xc   :  { %s835_s15 = smov 128   ;;  %s836_s16 = smov 8  }
   0xd   :  { %32 = dma.hbm_to_vmem [thread:$0]  %s906_s1, 8192, %s27_s13, [#allocation6], %s835_s15, %s835_s15, %s836_s16  }
   0xe   :  { %s837_s19 = smov [#allocation2]   ;;  %s838_s21 = smov [#allocation7]  }
   0xf   :  { %s17_s20 = sshll.u32 %s837_s19, 4  ;;  %s39_s22 = sshll.u32 %s838_s21, 4  ;;  %s18_s20 = int_to_ptr.vmem [resolvable:$true] %s17_s20  ;;  %s40_s22 = int_to_ptr.vmem [resolvable:$true] %s39_s22 }
  0x10   :  { %s776_s23 = scalar_lea.vmem %s18_s20, 128  ;;  %p781_p6 = scmp.lt.s32.totalorder %s18_s20, %s18_s20 }
  0x11   :  { %p777_p5 = scmp.ne.s32.totalorder %s18_s20, %s776_s23  ;;  %p782_p7 = scmp.lt.s32.totalorder %s776_s23, %s776_s23 }
  0x13   :  { %p783_p8 = por %p782_p7, %p781_p6 }
  0x15   :  { %p784_p9 = pnand %p783_p8, %p777_p5 }
  0x17   :  { %787 = shalt.err (!%p784_p9)
}
  0x18   :  { %20 = dma.hbm_to_vmem [thread:$0]  %s905_s0, 128, %s18_s20, [#allocation3]  }
  0x19   :  { %s796_s26 = scalar_lea.vmem %s40_s22, 256  ;;  %p801_p11 = scmp.lt.s32.totalorder %s40_s22, %s40_s22 }
  0x1a   :  { %p797_p10 = scmp.ne.s32.totalorder %s40_s22, %s796_s26  ;;  %p802_p12 = scmp.lt.s32.totalorder %s796_s26, %s796_s26 }
  0x1c   :  { %p803_p13 = por %p802_p12, %p801_p11 }
  0x1e   :  { %p804_p0 = pnand %p803_p13, %p797_p10 }
  0x20   :  { %807 = shalt.err (!%p804_p0)
}
  0x21   :  { %42 = dma.hbm_to_vmem [thread:$0]  %s907_s2, 256, %s40_s22, [#allocation6]  }
  0x22   :  { %828 = dma.done.wait [#allocation3], 128  }
  0x23   :  { %829 = vsyncadd [#allocation3], 4294967168 }
  0x24   :  { %830 = dma.done.wait [#allocation6], 8448  }
  0x25   :  { %831 = vsyncadd [#allocation6], 4294958848  ;;  %v839_v0 = vmov 0.0   ;;  %vm840_vm0 = vmmov 0   ;;  %v696_v1 = vld [vmem:[#allocation5 + $0x70] ss:$8 sps:$4 sm:$0xff]   ;;  %v291_v61 = vlaneseq }
  0x26   :  { %627 = vmatprep.subr.bf16.mxu0 %v839_v0  ;;  %643 = vmatprep.mubr.msk.bf16.mxu0 %vm840_vm0, %v839_v0  ;;  %v697_v2 = vld [vmem:[#allocation5 + $0x60] ss:$8 sps:$4 sm:$0xff]   ;;  %v698_v3 = vld [vmem:[#allocation5 + $0x50] ss:$8 sps:$4 sm:$0xff]   ;;  %v714_v20 = vld [vmem:[#allocation5 + $0x174] ss:$8 sps:$4 sm:$0xff]  }
  0x27   :  { %647 = vmatprep.subr.bf16.mxu1 %v839_v0  ;;  %663 = vmatprep.mubr.msk.bf16.mxu1 %vm840_vm0, %v839_v0  ;;  %v704_v4 = vld [vmem:[#allocation5 + $0xf0] ss:$8 sps:$4 sm:$0xff]   ;;  %v699_v5 = vld [vmem:[#allocation5 + $0x40] ss:$8 sps:$4 sm:$0xff]   ;;  %v717_v21 = vld [vmem:[#allocation5 + $0x164] ss:$8 sps:$4 sm:$0xff]  }
  0x28   :  { %628 = vmatpush3.bf16.msra.mxu0 %v696_v1  ;;  %648 = vmatpush3.bf16.msra.mxu1 %v704_v4  ;;  %v705_v6 = vld [vmem:[#allocation5 + $0xe0] ss:$8 sps:$4 sm:$0xff]   ;;  %v700_v7 = vld [vmem:[#allocation5 + $0x30] ss:$8 sps:$4 sm:$0xff]   ;;  %v720_v23 = vld [vmem:[#allocation5 + $0x154] ss:$8 sps:$4 sm:$0xff]  }
  0x29   :  { %629 = vmatprep.subr.bf16.mxu0 %v839_v0  ;;  %649 = vmatprep.subr.bf16.mxu1 %v839_v0  ;;  %v706_v8 = vld [vmem:[#allocation5 + $0xd0] ss:$8 sps:$4 sm:$0xff]   ;;  %v701_v9 = vld [vmem:[#allocation5 + $0x20] ss:$8 sps:$4 sm:$0xff]   ;;  %v723_v25 = vld [vmem:[#allocation5 + $0x144] ss:$8 sps:$4 sm:$0xff]  }
  0x2a   :  { %v707_v10 = vld [vmem:[#allocation5 + $0xc0] ss:$8 sps:$4 sm:$0xff]   ;;  %v702_v11 = vld [vmem:[#allocation5 + $0x10] ss:$8 sps:$4 sm:$0xff]   ;;  %v726_v27 = vld [vmem:[#allocation5 + $0x134] ss:$8 sps:$4 sm:$0xff]  }
  0x2b   :  { %v708_v12 = vld [vmem:[#allocation5 + $0xb0] ss:$8 sps:$4 sm:$0xff]   ;;  %v703_v13 = vld [vmem:[#allocation5] ss:$8 sps:$4 sm:$0xff]   ;;  %v729_v29 = vld [vmem:[#allocation5 + $0x124] ss:$8 sps:$4 sm:$0xff]  }
  0x2c   :  { %630 = vmatpush3.bf16.msra.mxu0 %v697_v2  ;;  %650 = vmatpush3.bf16.msra.mxu1 %v705_v6  ;;  %v53_v14 = vld [vmem:[#allocation2] sm:$0xff]  ;;  %v709_v15 = vld [vmem:[#allocation5 + $0xa0] ss:$8 sps:$4 sm:$0xff]   ;;  %v735_v41 = vld [vmem:[#allocation5 + $0x104] ss:$8 sps:$4 sm:$0xff]   ;;  %v841_v43 = vmov 0  }
  0x2d   :  { %631 = vmatprep.subr.bf16.mxu0 %v839_v0  ;;  %651 = vmatprep.subr.bf16.mxu1 %v839_v0  ;;  %v54_v16 = vpack.c.bf16 %v53_v14, %v53_v14  ;;  %v710_v17 = vld [vmem:[#allocation5 + $0x90] ss:$8 sps:$4 sm:$0xff]   ;;  %v711_v18 = vld [vmem:[#allocation5 + $0x80] ss:$8 sps:$4 sm:$0xff]   ;;  %v732_v39 = vld [vmem:[#allocation5 + $0x114] ss:$8 sps:$4 sm:$0xff]  }
  0x2e   :  { %v712_v19 = vld [vmem:[#allocation5 + $0x170] ss:$8 sps:$4 sm:$0xff]   ;;  %v715_v22 = vld [vmem:[#allocation5 + $0x160] ss:$8 sps:$4 sm:$0xff]   ;;  %v292_v62 = vshrl.u32 %v291_v61, 7  ;;  %s842_s0 = smov [#allocation8]  }
  0x2f   :  { %v718_v24 = vld [vmem:[#allocation5 + $0x150] ss:$8 sps:$4 sm:$0xff]   ;;  %v721_v26 = vld [vmem:[#allocation5 + $0x140] ss:$8 sps:$4 sm:$0xff]   ;;  %s550_s2 = sshll.u32 %s842_s0, 4  ;;  %s551_s2 = int_to_ptr.vmem [resolvable:$true] %s550_s2 }
  0x30   :  { %632 = vmatpush3.bf16.msra.mxu0 %v698_v3  ;;  %652 = vmatpush3.bf16.msra.mxu1 %v706_v8  ;;  %v724_v28 = vld [vmem:[#allocation5 + $0x130] ss:$8 sps:$4 sm:$0xff]   ;;  %v727_v30 = vld [vmem:[#allocation5 + $0x120] ss:$8 sps:$4 sm:$0xff]   ;;  %v293_v63 = vsub.s32 0, %v292_v62  ;;  %v297_v2 = vsub.s32 1, %v292_v62  ;;  %p813_p2 = scmp.lt.s32.totalorder %s551_s2, %s551_s2 }
  0x31   :  { %633 = vmatprep.subr.bf16.mxu0 %v839_v0  ;;  %653 = vmatprep.subr.bf16.mxu1 %v839_v0  ;;  %v71_v31 = vld [vmem:[#allocation7] ss:$0 sm:$0xff]  ;;  %v730_v40 = vld [vmem:[#allocation5 + $0x110] ss:$8 sps:$4 sm:$0xff]   ;;  %v179_v50 = vld [vmem:[#allocation7 + $0x1] ss:$0 sm:$0xff] }
  0x32   :  { %v733_v42 = vld [vmem:[#allocation5 + $0x100] ss:$8 sps:$4 sm:$0xff]   ;;  %v736_v44 = vld [vmem:[#allocation5 + $0x1f0] ss:$8 sps:$4 sm:$0xff]   ;;  %s808_s28 = scalar_lea.vmem %s551_s2, 128 }
  0x33   :  { %v737_v45 = vld [vmem:[#allocation5 + $0x1e0] ss:$8 sps:$4 sm:$0xff]   ;;  %v738_v46 = vld [vmem:[#allocation5 + $0x1d0] ss:$8 sps:$4 sm:$0xff]   ;;  %p809_p1 = scmp.ne.s32.totalorder %s551_s2, %s808_s28  ;;  %p814_p3 = scmp.lt.s32.totalorder %s808_s28, %s808_s28 }
  0x34   :  { %634 = vmatpush3.bf16.msra.mxu0 %v699_v5  ;;  %654 = vmatpush3.bf16.msra.mxu1 %v707_v10  ;;  %v739_v47 = vld [vmem:[#allocation5 + $0x1c0] ss:$8 sps:$4 sm:$0xff]   ;;  %v740_v48 = vld [vmem:[#allocation5 + $0x1b0] ss:$8 sps:$4 sm:$0xff]  }
  0x35   :  { %635 = vmatprep.subr.bf16.mxu0 %v839_v0  ;;  %655 = vmatprep.subr.bf16.mxu1 %v839_v0  ;;  %v741_v49 = vld [vmem:[#allocation5 + $0x1a0] ss:$8 sps:$4 sm:$0xff]   ;;  %v742_v59 = vld [vmem:[#allocation5 + $0x190] ss:$8 sps:$4 sm:$0xff]   ;;  %p815_p4 = por %p814_p3, %p813_p2 }
  0x36   :  { %v743_v60 = vld [vmem:[#allocation5 + $0x180] ss:$8 sps:$4 sm:$0xff]  }
  0x37   :  { %v289_v1 = vld [vmem:[#allocation7 + $0x2] ss:$8 sm:$0x3]  ;;  %p816_p5 = pnand %p815_p4, %p809_p1 }
  0x38   :  { %636 = vmatpush3.bf16.msra.mxu0 %v700_v7  ;;  %656 = vmatpush3.bf16.msra.mxu1 %v708_v12  ;;  %v294_v3 = vrot.slane %v289_v1, %v293_v63  ;;  %v298_v4 = vrot.slane %v289_v1, %v297_v2 }
  0x39   :  { %637 = vmatprep.subr.bf16.mxu0 %v839_v0  ;;  %657 = vmatprep.subr.bf16.mxu1 %v839_v0 }
  0x3c   :  { %638 = vmatpush3.bf16.msra.mxu0 %v701_v9  ;;  %658 = vmatpush3.bf16.msra.mxu1 %v709_v15 }
  0x3d   :  { %639 = vmatprep.subr.bf16.mxu0 %v839_v0  ;;  %659 = vmatprep.subr.bf16.mxu1 %v839_v0 }
  0x40   :  { %640 = vmatpush3.bf16.msra.mxu0 %v702_v11  ;;  %660 = vmatpush3.bf16.msra.mxu1 %v710_v17 }
  0x41   :  { %641 = vmatprep.subr.bf16.mxu0 %v839_v0  ;;  %661 = vmatprep.subr.bf16.mxu1 %v839_v0 }
  0x44   :  { %642 = vmatpush3.bf16.msra.mxu0 %v703_v13  ;;  %662 = vmatpush3.bf16.msra.mxu1 %v711_v18 }
  0x45   :  { %667 = vmatprep.subr.bf16.mxu1 %v839_v0  ;;  %381 = vmatprep.subr.bf16.mxu0 %v714_v20 }
  0x47   :  { %644 = vmatmul.mubr.bf16.vlgmr.msra.gmra.mxu0 %v54_v16 }
  0x48   :  { %382 = vmatpush1.bf16.msra.mxu0 %v712_v19  ;;  %413 = vmatprep.mubr.bf16.mxu0 %v841_v43 }
  0x49   :  { %383 = vmatprep.subr.bf16.mxu0 %v717_v21 }
  0x4c   :  { %384 = vmatpush1.bf16.msra.mxu0 %v715_v22 }
  0x4d   :  { %385 = vmatprep.subr.bf16.mxu0 %v720_v23 }
  0x50   :  { %386 = vmatpush1.bf16.msra.mxu0 %v718_v24 }
  0x51   :  { %387 = vmatprep.subr.bf16.mxu0 %v723_v25 }
  0x54   :  { %388 = vmatpush1.bf16.msra.mxu0 %v721_v26 }
  0x55   :  { %389 = vmatprep.subr.bf16.mxu0 %v726_v27 }
  0x58   :  { %390 = vmatpush1.bf16.msra.mxu0 %v724_v28 }
  0x59   :  { %391 = vmatprep.subr.bf16.mxu0 %v729_v29 }
  0x5c   :  { %392 = vmatpush1.bf16.msra.mxu0 %v727_v30 }
  0x5d   :  { %393 = vmatprep.subr.bf16.mxu0 %v732_v39 }
  0x60   :  { %394 = vmatpush1.bf16.msra.mxu0 %v730_v40 }
  0x61   :  { %395 = vmatprep.subr.bf16.mxu0 %v735_v41 }
  0x64   :  { %396 = vmatpush1.bf16.msra.mxu0 %v733_v42 }
 0x107   :  { %v154_v32 = vpop.f32.mrf.mxu0 }
 0x108   :  { %v155_v33 = vadd.f32 %v154_v32, %v71_v31 }
 0x109   :  { %v645_v34 = vpop.f32.mrf.mxu0 }
 0x10a   :  { %v160_v35 = vmax.f32 %v155_v33, 0.0 }
 0x10b   :  { %v157_v36 = vpop.f32.mrf.mxu0 }
 0x10c   :  { %v161_v37 = vpack.c.bf16 %v160_v35, %v160_v35 }
 0x10d   :  { %v646_v38 = vpop.f32.mrf.mxu0 }
 0x10e   :  { %664 = vmatmul.mubr.bf16.vlgmr.msra.gmra.mxu1 %v161_v37 }
 0x10f   :  { %683 = vmatprep.mubr.msk.bf16.mxu1 %vm840_vm0, %v839_v0  ;;  %668 = vmatpush3.bf16.msra.mxu1 %v736_v44 }
 0x110   :  { %669 = vmatprep.subr.bf16.mxu1 %v839_v0 }
 0x113   :  { %670 = vmatpush3.bf16.msra.mxu1 %v737_v45 }
 0x114   :  { %671 = vmatprep.subr.bf16.mxu1 %v839_v0 }
 0x117   :  { %672 = vmatpush3.bf16.msra.mxu1 %v738_v46 }
 0x118   :  { %673 = vmatprep.subr.bf16.mxu1 %v839_v0 }
 0x11b   :  { %674 = vmatpush3.bf16.msra.mxu1 %v739_v47 }
 0x11c   :  { %675 = vmatprep.subr.bf16.mxu1 %v839_v0 }
 0x11f   :  { %676 = vmatpush3.bf16.msra.mxu1 %v740_v48 }
 0x120   :  { %677 = vmatprep.subr.bf16.mxu1 %v839_v0 }
 0x123   :  { %678 = vmatpush3.bf16.msra.mxu1 %v741_v49 }
 0x124   :  { %679 = vmatprep.subr.bf16.mxu1 %v839_v0 }
 0x127   :  { %680 = vmatpush3.bf16.msra.mxu1 %v742_v59 }
 0x128   :  { %681 = vmatprep.subr.bf16.mxu1 %v839_v0  ;;  %v442_v0 = vld [vmem:[#allocation7 + $0x3] ss:$0 sm:$0xff] }
 0x12b   :  { %682 = vmatpush3.bf16.msra.mxu1 %v743_v60 }
 0x1ce   :  { %v262_v51 = vpop.f32.mrf.mxu1 }
 0x1cf   :  { %v263_v52 = vadd.f32 %v262_v51, %v179_v50 }
 0x1d0   :  { %v665_v53 = vpop.f32.mrf.mxu1 }
 0x1d1   :  { %v268_v54 = vmax.f32 %v263_v52, 0.0 }
 0x1d2   :  { %v265_v55 = vpop.f32.mrf.mxu1 }
 0x1d3   :  { %v269_v56 = vadd.f32 %v268_v54, %v160_v35 }
 0x1d4   :  { %v666_v57 = vpop.f32.mrf.mxu1 }
 0x1d5   :  { %v270_v58 = vpack.c.bf16 %v269_v56, %v269_v56 }
 0x1d7   :  { %414 = vmatmul.mubr.bf16.vlgmr.msra.gmra.mxu0 %v270_v58 }
 0x297   :  { %v415_v5 = vpop.f32.mrf.mxu0 }
 0x298   :  { %v416_v6 = vadd.f32 %v415_v5, %v294_v3 }
 0x299   :  { %v417_v7 = vpop.f32.mrf.mxu0 }
 0x29a   :  { %v422_v8 = vmax.f32 %v416_v6, 0.0  ;;  %v418_v9 = vadd.f32 %v417_v7, %v298_v4 }
 0x29b   :  { %v419_v10 = vpop.f32.mrf.mxu0 }
 0x29c   :  { %v423_v11 = vadd.f32 %v422_v8, %v418_v9 }
 0x29d   :  { %v420_v12 = vpop.f32.mrf.mxu0 }
 0x29e   :  { %v424_v13 = vpack.c.bf16 %v423_v11, %v423_v11 }
 0x2a0   :  { %684 = vmatmul.mubr.bf16.vlgmr.msra.gmra.mxu1 %v424_v13 }
 0x360   :  { %v525_v14 = vpop.f32.mrf.mxu1 }
 0x361   :  { %v526_v15 = vadd.f32 %v525_v14, %v442_v0 }
 0x362   :  { %v685_v16 = vpop.f32.mrf.mxu1 }
 0x363   :  { %531 = vmax.xlane.f32.xlu0 %v526_v15 }
 0x364   :  { %v528_v17 = vpop.f32.mrf.mxu1 }
 0x366   :  { %v686_v18 = vpop.f32.mrf.mxu1 }
 0x3ec   :  { %v532_v19 = vpop.xlane.xlu0 %531 }
 0x3ed   :  { %v533_v20 = vsub.f32 %v526_v15, %v532_v19 }
 0x3ef   :  { %v534_v21 = vmul.f32 1.442695, %v533_v20 }
 0x3f1   :  { %744 = vpow2.f32 %v534_v21 }
 0x3fe   :  { %v745_v22 = vpop.eup %744 }
 0x3ff   :  { %536 = vadd.xlane.f32.xlu0 %v745_v22 }
 0x488   :  { %v537_v23 = vpop.xlane.xlu0 %536 }
 0x489   :  { %746 = vrcp.f32 %v537_v23 }
 0x496   :  { %v747_v24 = vpop.eup %746 }
 0x497   :  { %v539_v25 = vmul.f32 %v747_v24, %v537_v23 }
 0x499   :  { %v540_v26 = vsub.f32 2.0, %v539_v25 }
 0x49b   :  { %v541_v27 = vmul.f32 %v747_v24, %v540_v26 }
 0x49d   :  { %v542_v28 = vmul.f32 %v745_v22, %v541_v27 }
 0x49f   :  { %543 = vst [vmem:[#allocation8] sm:$0xff] %v542_v28 }
 0x4a0   :  { %819 = shalt.err (!%p816_p5)
}
 0x4a1   :  { %553 = dma.vmem_to_hbm [thread:$0]  %s551_s2, 128, %s908_s3, [#allocation4]  }
 0x4a2   :  { %832 = dma.done.wait [#allocation4], 128  }
 0x4a3   :  { %833 = vsyncadd [#allocation4], 4294967168 }
 0x4a4   :  { %557 = vsyncpa [#allocation3], 1 }
 0x4a5   :  { %558 = vsyncpa [#allocation6], 1 }
 0x4a6   :  { %559 = vsyncpa [#allocation4], 1 }

</bundles_post_ra>
